<compile_context>
chip_gen: v5e
topology: v5e:2x2
jax: 0.10.0
libtpu: 0.0.40
codegen_flags: <defaults>
</compile_context>

<pallas_src>
import functools
import jax
import jax.numpy as jnp
from jax.experimental import pallas as pl
from jax.experimental.pallas import tpu as pltpu

HDF = 6  # hidden_dim_factor
IN_FEATURES = 8
OUT_FEATURES = 4
LAYER_DIMS = [
    (IN_FEATURES, 4 * HDF),
    (4 * HDF, 8 * HDF),
    (8 * HDF, 4 * HDF),
    (4 * HDF, 2 * HDF),
    (2 * HDF, HDF),
    (HDF, OUT_FEATURES),
]
ROW_TILE = 1024  # samples per grid step (lane axis); multiple of 128


def _round8(v):
    return (v + 7) // 8 * 8


# Packed parameter-slab geometry (feature-major, one VMEM block).
ROW_OFFSETS = []
_off = 0
for _fin, _fout in LAYER_DIMS:
    ROW_OFFSETS.append(_off)
    _off += _round8(_fout)          # 8-sublane-aligned row blocks per layer
SLAB_ROWS = _round8(_off)           # = 128
MAX_FIN = max(fin for fin, _ in LAYER_DIMS)   # = 48
SLAB_COLS = MAX_FIN + 1             # last column holds the bias


# ----------------------------------------------------------------------------
# Pallas kernel: 6-layer SiLU MLP -> (alpha, beta, gamma, amplitude),
#                then B_out = amplitude * R(alpha,beta,gamma) @ B_analytical.
# Feature-major: feats_ref (8,T), bana_ref (3,T), out_ref (3,T).
# ----------------------------------------------------------------------------
def _mlp_correct_kernel(feats_ref, bana_ref, slab_ref, out_ref):
    def silu(v):
        # v * sigmoid(v); exp + approx reciprocal both ride the EUP slot.
        return v * pl.reciprocal(1.0 + jnp.exp(-v), approx=True)

    h = feats_ref[...]                                     # (8, T)
    n_layers = len(LAYER_DIMS)
    for li, (fin, fout) in enumerate(LAYER_DIMS):
        off = ROW_OFFSETS[li]
        w = slab_ref[pl.ds(off, fout), pl.ds(0, fin)]      # (fout, fin)
        b = slab_ref[pl.ds(off, fout), pl.ds(MAX_FIN, 1)]  # (fout, 1)
        z = jnp.dot(w, h, preferred_element_type=jnp.float32) + b
        h = silu(z) if li < n_layers - 1 else z
    pred = h                                               # (4, T)

    alpha = pred[0:1, :]
    beta = pred[1:2, :]
    gamma = pred[2:3, :]
    amp = pred[3:4, :]

    ca, sa = jnp.cos(alpha), jnp.sin(alpha)
    cb, sb = jnp.cos(beta), jnp.sin(beta)
    cg, sg = jnp.cos(gamma), jnp.sin(gamma)

    # R = Rz(alpha) @ Ry(beta) @ Rx(gamma)  (intrinsic ZYX Euler angles)
    r00 = ca * cb
    r01 = ca * sb * sg - sa * cg
    r02 = ca * sb * cg + sa * sg
    r10 = sa * cb
    r11 = sa * sb * sg + ca * cg
    r12 = sa * sb * cg - ca * sg
    r20 = -sb
    r21 = cb * sg
    r22 = cb * cg

    bx = bana_ref[0:1, :]
    by = bana_ref[1:2, :]
    bz = bana_ref[2:3, :]

    # direct row stores (no concatenate / shuffle), fully lane-dense
    out_ref[pl.ds(0, 1), :] = amp * (r00 * bx + r01 * by + r02 * bz)
    out_ref[pl.ds(1, 1), :] = amp * (r10 * bx + r11 * by + r12 * bz)
    out_ref[pl.ds(2, 1), :] = amp * (r20 * bx + r21 * by + r22 * bz)


def _choose_tile(n):
    """Largest lane tile <= ROW_TILE that keeps the grid >= 2 when possible."""
    n128 = -(-n // 128) * 128
    if n128 <= 128:
        return 128
    half = -(-(n128 // 2) // 128) * 128
    return max(128, min(ROW_TILE, half))


def pack_params(params):
    """Pack (fin,fout)/(1,fout) Linear params into one feature-major slab."""
    slab = jnp.zeros((SLAB_ROWS, SLAB_COLS), jnp.float32)
    for li, (fin, fout) in enumerate(LAYER_DIMS):
        w = jnp.asarray(params[2 * li], jnp.float32)            # (fin, fout)
        b = jnp.asarray(params[2 * li + 1], jnp.float32).reshape(fout)
        off = ROW_OFFSETS[li]
        slab = slab.at[off:off + fout, 0:fin].set(w.T)
        slab = slab.at[off:off + fout, MAX_FIN].set(b)
    return slab


def pallas_forward(feats, b_ana, slab, tile=None):
    """feats (N,8), b_ana (N,3)  ->  (N,3). Transposes to lane-dense layout."""
    n = feats.shape[0]
    if tile is None:
        tile = _choose_tile(n)
    n_pad = pl.cdiv(n, tile) * tile
    feats_t = jnp.zeros((IN_FEATURES, n_pad), jnp.float32).at[:, :n].set(feats.T)
    bana_t = jnp.zeros((3, n_pad), jnp.float32).at[:, :n].set(b_ana.T)
    out_t = pl.pallas_call(
        _mlp_correct_kernel,
        out_shape=jax.ShapeDtypeStruct((3, n_pad), jnp.float32),
        grid_spec=pltpu.PrefetchScalarGridSpec(
            num_scalar_prefetch=0,
            grid=(n_pad // tile,),
            in_specs=[
                pl.BlockSpec((IN_FEATURES, tile), lambda i: (0, i)),
                pl.BlockSpec((3, tile), lambda i: (0, i)),
                pl.BlockSpec((SLAB_ROWS, SLAB_COLS), lambda i: (0, 0)),
            ],
            out_specs=pl.BlockSpec((3, tile), lambda i: (0, i)),
        ),
        compiler_params=pltpu.CompilerParams(
            dimension_semantics=("parallel",)),
    )(feats_t, bana_t, slab)
    return out_t[:, :n].T


# ----------------------------------------------------------------------------
# Pure-JAX reference of the same math (used for the divergence via forward-mode
# autodiff and for a correctness check of the kernel).
# ----------------------------------------------------------------------------
def batch_rotation_matrices(angles):
    a, b, g = angles[:, 0], angles[:, 1], angles[:, 2]
    ca, sa = jnp.cos(a), jnp.sin(a)
    cb, sb = jnp.cos(b), jnp.sin(b)
    cg, sg = jnp.cos(g), jnp.sin(g)
    row0 = jnp.stack([ca * cb, ca * sb * sg - sa * cg, ca * sb * cg + sa * sg], axis=-1)
    row1 = jnp.stack([sa * cb, sa * sb * sg + ca * cg, sa * sb * cg - ca * sg], axis=-1)
    row2 = jnp.stack([-sb, cb * sg, cb * cg], axis=-1)
    return jnp.stack([row0, row1, row2], axis=-2)


def _mlp_correct_ref(feats, b_ana, params):
    silu = lambda v: v * jax.nn.sigmoid(v)
    h = feats
    for li in range(5):
        h = silu(h @ params[2 * li] + params[2 * li + 1])
    pred = h @ params[10] + params[11]
    angles = pred[:, :3]
    amp = pred[:, 3]
    rmats = batch_rotation_matrices(angles)
    return amp[:, None] * jnp.einsum('nij,nj->ni', rmats, b_ana)


# ----------------------------------------------------------------------------
# Physics helpers (plain-JAX glue).  These functions are not defined in the
# provided PyTorch source; standard analytic forms are used.
# ----------------------------------------------------------------------------
def Dz_cuboid(dimensions):
    """Demagnetizing factor along z of a rectangular prism (Aharoni 1998)."""
    a = dimensions[:, 0] / 2.0
    b = dimensions[:, 1] / 2.0
    c = dimensions[:, 2] / 2.0
    r_abc = jnp.sqrt(a * a + b * b + c * c)
    r_ab = jnp.sqrt(a * a + b * b)
    r_bc = jnp.sqrt(b * b + c * c)
    r_ac = jnp.sqrt(a * a + c * c)
    pi_dz = (
        (b * b - c * c) / (2 * b * c) * jnp.log((r_abc - a) / (r_abc + a))
        + (a * a - c * c) / (2 * a * c) * jnp.log((r_abc - b) / (r_abc + b))
        + b / (2 * c) * jnp.log((r_ab + a) / (r_ab - a))
        + a / (2 * c) * jnp.log((r_ab + b) / (r_ab - b))
        + c / (2 * a) * jnp.log((r_bc - b) / (r_bc + b))
        + c / (2 * b) * jnp.log((r_ac - a) / (r_ac + a))
        + 2.0 * jnp.arctan2(a * b, c * r_abc)
        + (a ** 3 + b ** 3 - 2 * c ** 3) / (3 * a * b * c)
        + (a * a + b * b - 2 * c * c) / (3 * a * b * c) * r_abc
        + c / (a * b) * (r_ac + r_bc)
        - (r_ab ** 3 + r_bc ** 3 + r_ac ** 3) / (3 * a * b * c)
    )
    return pi_dz / jnp.pi


def Bfield_homogeneous(observers, dimensions, polarizations):
    """Analytic B-field of a homogeneously z-polarized cuboid (Camacho & Sosa)."""
    # TODO(synk): x/y polarization contributions omitted (identically zero here).
    x, y, z = observers[:, 0], observers[:, 1], observers[:, 2]
    a = dimensions[:, 0] / 2.0
    b = dimensions[:, 1] / 2.0
    c = dimensions[:, 2] / 2.0
    jz = polarizations[:, 2]
    bx = jnp.zeros_like(x)
    by = jnp.zeros_like(x)
    bz = jnp.zeros_like(x)
    for k, xs in enumerate((x + a, x - a)):
        for l, ys in enumerate((y + b, y - b)):
            for m, zs in enumerate((z + c, z - c)):
                sgn = (-1.0) ** (k + l + m)
                r = jnp.sqrt(xs * xs + ys * ys + zs * zs)
                bx = bx + sgn * jnp.log(ys + r)
                by = by + sgn * jnp.log(xs + r)
                bz = bz - sgn * jnp.arctan2(xs * ys, zs * r)
    coef = jz / (4.0 * jnp.pi)
    return coef[:, None] * jnp.stack([bx, by, bz], axis=1)


def prepare_inputs(x):
    n = x.shape[0]
    observers = x[:, 5:8]
    dimensions = jnp.concatenate([x[:, :2], jnp.ones((n, 1), x.dtype)], axis=1)
    jz = 1.0 / (1.0 + x[:, 4] * Dz_cuboid(dimensions))
    zeros = jnp.zeros((n,), x.dtype)
    polarizations = jnp.stack([zeros, zeros, jz], axis=1)
    susceptibilities = x[:, 2:5]
    return observers, dimensions, polarizations, susceptibilities


# ----------------------------------------------------------------------------
# Full forward: (B, divergence_B)
# ----------------------------------------------------------------------------
def field_correction_forward(x, slab, params):
    observers, dimensions, polarizations, susceptibilities = prepare_inputs(x)

    def feats_bana(obs):
        feats = jnp.concatenate(
            [dimensions[:, :2], susceptibilities, obs / dimensions], axis=1)
        b_ana = Bfield_homogeneous(obs, dimensions, polarizations)
        return feats, b_ana

    feats, b_ana = feats_bana(observers)
    B = pallas_forward(feats, b_ana, slab)          # single Pallas launch

    # divB via forward-mode autodiff of the pure-JAX equivalent of the kernel
    # math (Pallas calls are not auto-differentiable). The primal is linearized
    # ONCE; the 3 directional derivatives are cheap tangent applications —
    # no redundant kernel launches or repeated reference-primal evaluations.
    def B_ref_fn(obs):
        f, ba = feats_bana(obs)
        return _mlp_correct_ref(f, ba, params)

    _, B_lin = jax.linearize(B_ref_fn, observers)
    div = jnp.zeros((x.shape[0],), jnp.float32)
    for i in range(3):
        tang = jnp.zeros_like(observers).at[:, i].set(1.0)
        div = div + B_lin(tang)[:, i]
    return B, div


def make_params(key):
    """Deterministic init matching nn.Linear default U(-1/sqrt(fan_in), +...)."""
    params = []
    for fin, fout in LAYER_DIMS:
        key, kw, kb = jax.random.split(key, 3)
        bound = fin ** -0.5
        w = jax.random.uniform(kw, (fin, fout), jnp.float32, -bound, bound)
        b = jax.random.uniform(kb, (1, fout), jnp.float32, -bound, bound)
        params += [w, b]
    return params


if __name__ == "__main__":
    n = 16
    key = jax.random.PRNGKey(0)
    u = jax.random.normal(key, (n, 8), jnp.float32)
    dims_ab = 1.0 + 0.2 * jnp.abs(u[:, :2])        # cuboid side lengths a, b
    susc = 0.05 * jnp.abs(u[:, 2:5])               # susceptibilities
    obs = 2.0 + jnp.abs(u[:, 5:8])                 # observers (outside cuboid)
    x = jnp.concatenate([dims_ab, susc, obs], axis=1)   # (16, 8)

    params = make_params(jax.random.PRNGKey(1))
    slab = pack_params(params)

    # sanity: Pallas core vs pure-JAX reference (approx reciprocal inside the
    # kernel's SiLU introduces a small relative error -> loose tolerance)
    o, d, p, s = prepare_inputs(x)
    feats = jnp.concatenate([d[:, :2], s, o / d], axis=1)
    b_ana = Bfield_homogeneous(o, d, p)
    out_kernel = pallas_forward(feats, b_ana, slab)
    out_ref = _mlp_correct_ref(feats, b_ana, params)
    assert jnp.allclose(out_kernel, out_ref, atol=5e-3, rtol=5e-3)

    fwd = jax.jit(functools.partial(field_correction_forward,
                                    slab=slab, params=params))
    B, div_B = fwd(x)
    jax.block_until_ready((B, div_B))

    assert B.shape == (n, 3) and div_B.shape == (n,)
    assert bool(jnp.all(jnp.isfinite(B))) and bool(jnp.all(jnp.isfinite(div_B)))
    print("KERNEL_OK")
</pallas_src>

<mosaic_0001>
module attributes {stable_mosaic.version = 11 : i64} {
  func.func @_mlp_correct_kernel(%arg0: i32, %arg1: memref<8x128xf32, #tpu.memory_space<vmem>>, %arg2: memref<3x128xf32, #tpu.memory_space<vmem>>, %arg3: memref<128x49xf32, #tpu.memory_space<vmem>>, %arg4: memref<3x128xf32, #tpu.memory_space<vmem>>) attributes {dimension_semantics = [#tpu.dimension_semantics<parallel>], iteration_bounds = array<i64: 1>, scalar_prefetch = 0 : i64, scratch_operands = 0 : i64, tpu.core_type = #tpu.core_type<tc>, window_params = [{transform_indices = @transform_0, window_bounds = array<i64: 8, 128>}, {transform_indices = @transform_1, window_bounds = array<i64: 3, 128>}, {pipeline_mode = #tpu.pipeline_mode<synchronous>, transform_indices = @transform_2, window_bounds = array<i64: 128, 49>}, {transform_indices = @transform_3, window_bounds = array<i64: 3, 128>}]} {
    %c0 = arith.constant 0 : index
    %c0_0 = arith.constant 0 : index
    %0 = vector.load %arg1[%c0, %c0_0] : memref<8x128xf32, #tpu.memory_space<vmem>>, vector<8x128xf32>
    %c0_1 = arith.constant 0 : index
    %c0_2 = arith.constant 0 : index
    %1 = vector.load %arg3[%c0_1, %c0_2] : memref<128x49xf32, #tpu.memory_space<vmem>>, vector<24x8xf32>
    %c0_3 = arith.constant 0 : index
    %c48 = arith.constant 48 : index
    %2 = vector.load %arg3[%c0_3, %c48] : memref<128x49xf32, #tpu.memory_space<vmem>>, vector<24x1xf32>
    %cst = arith.constant dense<0.000000e+00> : vector<24x128xf32>
    %3 = tpu.matmul %1, %0, %cst {dimension_numbers = #tpu.dot_dimension_numbers<[1], [0], [0], [1], [0, 0, 1, 1], [], []>} : vector<24x8xf32>, vector<8x128xf32>, vector<24x128xf32> -> vector<24x128xf32>
    %4 = vector.broadcast %2 : vector<24x1xf32> to vector<24x128xf32>
    %5 = arith.addf %3, %4 : vector<24x128xf32>
    %cst_4 = arith.constant 0.000000e+00 : f32
    %6 = vector.broadcast %cst_4 : f32 to vector<24x128xf32>
    %7 = arith.subf %6, %5 : vector<24x128xf32>
    %8 = math.exp %7 : vector<24x128xf32>
    %cst_5 = arith.constant 1.000000e+00 : f32
    %9 = vector.broadcast %cst_5 : f32 to vector<24x128xf32>
    %10 = arith.addf %9, %8 : vector<24x128xf32>
    %11 = tpu.reciprocal %10 {approx = true} : vector<24x128xf32> -> vector<24x128xf32>
    %12 = arith.mulf %5, %11 : vector<24x128xf32>
    %c24 = arith.constant 24 : index
    %c0_6 = arith.constant 0 : index
    %13 = vector.load %arg3[%c24, %c0_6] : memref<128x49xf32, #tpu.memory_space<vmem>>, vector<48x24xf32>
    %c24_7 = arith.constant 24 : index
    %c48_8 = arith.constant 48 : index
    %14 = vector.load %arg3[%c24_7, %c48_8] : memref<128x49xf32, #tpu.memory_space<vmem>>, vector<48x1xf32>
    %cst_9 = arith.constant dense<0.000000e+00> : vector<48x128xf32>
    %15 = tpu.matmul %13, %12, %cst_9 {dimension_numbers = #tpu.dot_dimension_numbers<[1], [0], [0], [1], [0, 0, 1, 1], [], []>} : vector<48x24xf32>, vector<24x128xf32>, vector<48x128xf32> -> vector<48x128xf32>
    %16 = vector.broadcast %14 : vector<48x1xf32> to vector<48x128xf32>
    %17 = arith.addf %15, %16 : vector<48x128xf32>
    %cst_10 = arith.constant 0.000000e+00 : f32
    %18 = vector.broadcast %cst_10 : f32 to vector<48x128xf32>
    %19 = arith.subf %18, %17 : vector<48x128xf32>
    %20 = math.exp %19 : vector<48x128xf32>
    %cst_11 = arith.constant 1.000000e+00 : f32
    %21 = vector.broadcast %cst_11 : f32 to vector<48x128xf32>
    %22 = arith.addf %21, %20 : vector<48x128xf32>
    %23 = tpu.reciprocal %22 {approx = true} : vector<48x128xf32> -> vector<48x128xf32>
    %24 = arith.mulf %17, %23 : vector<48x128xf32>
    %c72 = arith.constant 72 : index
    %c0_12 = arith.constant 0 : index
    %25 = vector.load %arg3[%c72, %c0_12] : memref<128x49xf32, #tpu.memory_space<vmem>>, vector<24x48xf32>
    %c72_13 = arith.constant 72 : index
    %c48_14 = arith.constant 48 : index
    %26 = vector.load %arg3[%c72_13, %c48_14] : memref<128x49xf32, #tpu.memory_space<vmem>>, vector<24x1xf32>
    %cst_15 = arith.constant dense<0.000000e+00> : vector<24x128xf32>
    %27 = tpu.matmul %25, %24, %cst_15 {dimension_numbers = #tpu.dot_dimension_numbers<[1], [0], [0], [1], [0, 0, 1, 1], [], []>} : vector<24x48xf32>, vector<48x128xf32>, vector<24x128xf32> -> vector<24x128xf32>
    %28 = vector.broadcast %26 : vector<24x1xf32> to vector<24x128xf32>
    %29 = arith.addf %27, %28 : vector<24x128xf32>
    %cst_16 = arith.constant 0.000000e+00 : f32
    %30 = vector.broadcast %cst_16 : f32 to vector<24x128xf32>
    %31 = arith.subf %30, %29 : vector<24x128xf32>
    %32 = math.exp %31 : vector<24x128xf32>
    %cst_17 = arith.constant 1.000000e+00 : f32
    %33 = vector.broadcast %cst_17 : f32 to vector<24x128xf32>
    %34 = arith.addf %33, %32 : vector<24x128xf32>
    %35 = tpu.reciprocal %34 {approx = true} : vector<24x128xf32> -> vector<24x128xf32>
    %36 = arith.mulf %29, %35 : vector<24x128xf32>
    %c96 = arith.constant 96 : index
    %c0_18 = arith.constant 0 : index
    %37 = vector.load %arg3[%c96, %c0_18] : memref<128x49xf32, #tpu.memory_space<vmem>>, vector<12x24xf32>
    %c96_19 = arith.constant 96 : index
    %c48_20 = arith.constant 48 : index
    %38 = vector.load %arg3[%c96_19, %c48_20] : memref<128x49xf32, #tpu.memory_space<vmem>>, vector<12x1xf32>
    %cst_21 = arith.constant dense<0.000000e+00> : vector<12x128xf32>
    %39 = tpu.matmul %37, %36, %cst_21 {dimension_numbers = #tpu.dot_dimension_numbers<[1], [0], [0], [1], [0, 0, 1, 1], [], []>} : vector<12x24xf32>, vector<24x128xf32>, vector<12x128xf32> -> vector<12x128xf32>
    %40 = vector.broadcast %38 : vector<12x1xf32> to vector<12x128xf32>
    %41 = arith.addf %39, %40 : vector<12x128xf32>
    %cst_22 = arith.constant 0.000000e+00 : f32
    %42 = vector.broadcast %cst_22 : f32 to vector<12x128xf32>
    %43 = arith.subf %42, %41 : vector<12x128xf32>
    %44 = math.exp %43 : vector<12x128xf32>
    %cst_23 = arith.constant 1.000000e+00 : f32
    %45 = vector.broadcast %cst_23 : f32 to vector<12x128xf32>
    %46 = arith.addf %45, %44 : vector<12x128xf32>
    %47 = tpu.reciprocal %46 {approx = true} : vector<12x128xf32> -> vector<12x128xf32>
    %48 = arith.mulf %41, %47 : vector<12x128xf32>
    %c112 = arith.constant 112 : index
    %c0_24 = arith.constant 0 : index
    %49 = vector.load %arg3[%c112, %c0_24] : memref<128x49xf32, #tpu.memory_space<vmem>>, vector<6x12xf32>
    %c112_25 = arith.constant 112 : index
    %c48_26 = arith.constant 48 : index
    %50 = vector.load %arg3[%c112_25, %c48_26] : memref<128x49xf32, #tpu.memory_space<vmem>>, vector<6x1xf32>
    %cst_27 = arith.constant dense<0.000000e+00> : vector<6x128xf32>
    %51 = tpu.matmul %49, %48, %cst_27 {dimension_numbers = #tpu.dot_dimension_numbers<[1], [0], [0], [1], [0, 0, 1, 1], [], []>} : vector<6x12xf32>, vector<12x128xf32>, vector<6x128xf32> -> vector<6x128xf32>
    %52 = vector.broadcast %50 : vector<6x1xf32> to vector<6x128xf32>
    %53 = arith.addf %51, %52 : vector<6x128xf32>
    %cst_28 = arith.constant 0.000000e+00 : f32
    %54 = vector.broadcast %cst_28 : f32 to vector<6x128xf32>
    %55 = arith.subf %54, %53 : vector<6x128xf32>
    %56 = math.exp %55 : vector<6x128xf32>
    %cst_29 = arith.constant 1.000000e+00 : f32
    %57 = vector.broadcast %cst_29 : f32 to vector<6x128xf32>
    %58 = arith.addf %57, %56 : vector<6x128xf32>
    %59 = tpu.reciprocal %58 {approx = true} : vector<6x128xf32> -> vector<6x128xf32>
    %60 = arith.mulf %53, %59 : vector<6x128xf32>
    %c120 = arith.constant 120 : index
    %c0_30 = arith.constant 0 : index
    %61 = vector.load %arg3[%c120, %c0_30] : memref<128x49xf32, #tpu.memory_space<vmem>>, vector<4x6xf32>
    %c120_31 = arith.constant 120 : index
    %c48_32 = arith.constant 48 : index
    %62 = vector.load %arg3[%c120_31, %c48_32] : memref<128x49xf32, #tpu.memory_space<vmem>>, vector<4x1xf32>
    %cst_33 = arith.constant dense<0.000000e+00> : vector<4x128xf32>
    %63 = tpu.matmul %61, %60, %cst_33 {dimension_numbers = #tpu.dot_dimension_numbers<[1], [0], [0], [1], [0, 0, 1, 1], [], []>} : vector<4x6xf32>, vector<6x128xf32>, vector<4x128xf32> -> vector<4x128xf32>
    %64 = vector.broadcast %62 : vector<4x1xf32> to vector<4x128xf32>
    %65 = arith.addf %63, %64 : vector<4x128xf32>
    %66 = vector.extract_strided_slice %65 {offsets = [0, 0], sizes = [1, 128], strides = [1, 1]} : vector<4x128xf32> to vector<1x128xf32>
    %67 = vector.extract_strided_slice %65 {offsets = [1, 0], sizes = [1, 128], strides = [1, 1]} : vector<4x128xf32> to vector<1x128xf32>
    %68 = vector.extract_strided_slice %65 {offsets = [2, 0], sizes = [1, 128], strides = [1, 1]} : vector<4x128xf32> to vector<1x128xf32>
    %69 = vector.extract_strided_slice %65 {offsets = [3, 0], sizes = [1, 128], strides = [1, 1]} : vector<4x128xf32> to vector<1x128xf32>
    %70 = math.cos %66 : vector<1x128xf32>
    %71 = math.sin %66 : vector<1x128xf32>
    %72 = math.cos %67 : vector<1x128xf32>
    %73 = math.sin %67 : vector<1x128xf32>
    %74 = math.cos %68 : vector<1x128xf32>
    %75 = math.sin %68 : vector<1x128xf32>
    %76 = arith.mulf %70, %72 : vector<1x128xf32>
    %77 = arith.mulf %70, %73 : vector<1x128xf32>
    %78 = arith.mulf %77, %75 : vector<1x128xf32>
    %79 = arith.mulf %71, %74 : vector<1x128xf32>
    %80 = arith.subf %78, %79 : vector<1x128xf32>
    %81 = arith.mulf %70, %73 : vector<1x128xf32>
    %82 = arith.mulf %81, %74 : vector<1x128xf32>
    %83 = arith.mulf %71, %75 : vector<1x128xf32>
    %84 = arith.addf %82, %83 : vector<1x128xf32>
    %85 = arith.mulf %71, %72 : vector<1x128xf32>
    %86 = arith.mulf %71, %73 : vector<1x128xf32>
    %87 = arith.mulf %86, %75 : vector<1x128xf32>
    %88 = arith.mulf %70, %74 : vector<1x128xf32>
    %89 = arith.addf %87, %88 : vector<1x128xf32>
    %90 = arith.mulf %71, %73 : vector<1x128xf32>
    %91 = arith.mulf %90, %74 : vector<1x128xf32>
    %92 = arith.mulf %70, %75 : vector<1x128xf32>
    %93 = arith.subf %91, %92 : vector<1x128xf32>
    %cst_34 = arith.constant 0.000000e+00 : f32
    %94 = vector.broadcast %cst_34 : f32 to vector<1x128xf32>
    %95 = arith.subf %94, %73 : vector<1x128xf32>
    %96 = arith.mulf %72, %75 : vector<1x128xf32>
    %97 = arith.mulf %72, %74 : vector<1x128xf32>
    %c0_35 = arith.constant 0 : index
    %c0_36 = arith.constant 0 : index
    %98 = vector.load %arg2[%c0_35, %c0_36] : memref<3x128xf32, #tpu.memory_space<vmem>>, vector<1x128xf32>
    %c1 = arith.constant 1 : index
    %c0_37 = arith.constant 0 : index
    %99 = vector.load %arg2[%c1, %c0_37] : memref<3x128xf32, #tpu.memory_space<vmem>>, vector<1x128xf32>
    %c2 = arith.constant 2 : index
    %c0_38 = arith.constant 0 : index
    %100 = vector.load %arg2[%c2, %c0_38] : memref<3x128xf32, #tpu.memory_space<vmem>>, vector<1x128xf32>
    %101 = arith.mulf %76, %98 : vector<1x128xf32>
    %102 = arith.mulf %80, %99 : vector<1x128xf32>
    %103 = arith.addf %101, %102 : vector<1x128xf32>
    %104 = arith.mulf %84, %100 : vector<1x128xf32>
    %105 = arith.addf %103, %104 : vector<1x128xf32>
    %106 = arith.mulf %69, %105 : vector<1x128xf32>
    %c0_39 = arith.constant 0 : index
    %c0_40 = arith.constant 0 : index
    %107 = vector.load %arg4[%c0_39, %c0_40] : memref<3x128xf32, #tpu.memory_space<vmem>>, vector<1x128xf32>
    tpu.vector_store %arg4[%c0_39, %c0_40], %106 {strides = array<i32>} : memref<3x128xf32, #tpu.memory_space<vmem>>, vector<1x128xf32>,
    %108 = arith.mulf %85, %98 : vector<1x128xf32>
    %109 = arith.mulf %89, %99 : vector<1x128xf32>
    %110 = arith.addf %108, %109 : vector<1x128xf32>
    %111 = arith.mulf %93, %100 : vector<1x128xf32>
    %112 = arith.addf %110, %111 : vector<1x128xf32>
    %113 = arith.mulf %69, %112 : vector<1x128xf32>
    %c1_41 = arith.constant 1 : index
    %c0_42 = arith.constant 0 : index
    %114 = vector.load %arg4[%c1_41, %c0_42] : memref<3x128xf32, #tpu.memory_space<vmem>>, vector<1x128xf32>
    tpu.vector_store %arg4[%c1_41, %c0_42], %113 {strides = array<i32>} : memref<3x128xf32, #tpu.memory_space<vmem>>, vector<1x128xf32>,
    %115 = arith.mulf %95, %98 : vector<1x128xf32>
    %116 = arith.mulf %96, %99 : vector<1x128xf32>
    %117 = arith.addf %115, %116 : vector<1x128xf32>
    %118 = arith.mulf %97, %100 : vector<1x128xf32>
    %119 = arith.addf %117, %118 : vector<1x128xf32>
    %120 = arith.mulf %69, %119 : vector<1x128xf32>
    %c2_43 = arith.constant 2 : index
    %c0_44 = arith.constant 0 : index
    %121 = vector.load %arg4[%c2_43, %c0_44] : memref<3x128xf32, #tpu.memory_space<vmem>>, vector<1x128xf32>
    tpu.vector_store %arg4[%c2_43, %c0_44], %120 {strides = array<i32>} : memref<3x128xf32, #tpu.memory_space<vmem>>, vector<1x128xf32>,
    return
  }
  func.func @transform_0(%arg0: i32) -> (i32, i32) {
    %c0_i32 = arith.constant 0 : i32
    %c0_i32_0 = arith.constant 0 : i32
    return %c0_i32, %arg0 : i32, i32
  }
  func.func @transform_1(%arg0: i32) -> (i32, i32) {
    %c0_i32 = arith.constant 0 : i32
    %c0_i32_0 = arith.constant 0 : i32
    return %c0_i32, %arg0 : i32, i32
  }
  func.func @transform_2(%arg0: i32) -> (i32, i32) {
    %c0_i32 = arith.constant 0 : i32
    %c0_i32_0 = arith.constant 0 : i32
    %c0_i32_1 = arith.constant 0 : i32
    return %c0_i32, %c0_i32_0 : i32, i32
  }
  func.func @transform_3(%arg0: i32) -> (i32, i32) {
    %c0_i32 = arith.constant 0 : i32
    %c0_i32_0 = arith.constant 0 : i32
    return %c0_i32, %arg0 : i32, i32
  }
}

</mosaic_0001>

<bundles_post_ra>
// kernel: tpu_custom_call.1
= control target key start
LH: loop header
LB: loop body
LE: loop exit
PB: predicated region body
PF: predicated region fallthrough
CT: control target
= control target key end

     0   :  { %vm34_vm0 = vcmask 64512   ;;  %v919_v3 = vmov 48   ;;  %s1121_s0 = inlined_call_operand.vmem [shape: f32[8,128], index: 0, kind: input, shape index: {}]   ;;  %s1122_s1 = inlined_call_operand.vmem [shape: f32[3,128], index: 1, kind: input, shape index: {}]   ;;  %s1123_s2 = inlined_call_operand.vmem [shape: f32[128,49], index: 2, kind: input, shape index: {}]   ;;  %s1124_s3 = inlined_call_operand.hbm [shape: f32[3,128], index: 3, kind: output, shape index: {}]  }
   0x1   :  { %v15_v0 = vld [vmem:[%s1121_s0] sm:$0xff]  ;;  %v18_v1 = vld [vmem:[%s1123_s2 + $0x10] sm:$0xff]  ;;  %831 = vset.pattern.permute.xlu1 %v919_v3  ;;  %830 = vset.pattern.permute.xlu0 %v919_v3 }
   0x2   :  { %v16_v2 = vld [vmem:[%s1123_s2] sm:$0xff]  ;;  %56 = vmatpush.msra.mxu0 %v15_v0  ;;  %31 = vperm.xlu0 %830, %v18_v1  }
   0x3   :  { %21 = vperm.xlu1 %831, %v16_v2   ;;  %791 = vmatmul.msk.f32.vlgmr.msra.gmra.mxu0 %vm34_vm0, %v16_v2 }
   0x4   :  { %832 = vset.pattern.permute.xlu2 %v919_v3 }
   0x5   :  { %8 = vsyncpa [#allocation3], 0  ;;  %v17_v4 = vld [vmem:[%s1123_s2 + $0x8] sm:$0xff]  ;;  %v964_v5 = vld [vmem:[%s1123_s2 + $0x40] sm:$0xff]  ;;  %vm121_vm1 = vcmask 195584   ;;  %vm223_vm2 = vcmask 392192  }
   0x6   :  { %v971_v6 = vld [vmem:[%s1123_s2 + $0x28] sm:$0xff]  ;;  %v976_v7 = vld [vmem:[%s1123_s2 + $0x20] sm:$0xff]  ;;  %v984_v8 = vld [vmem:[%s1123_s2 + $0x58] sm:$0xff]  ;;  %vm334_vm3 = vcmask 1043456   ;;  %vm331_vm4 = vcmask 97280   ;;  %vm373_vm5 = vcmask 1045504  }
   0x7   :  { %v989_v9 = vld [vmem:[%s1123_s2 + $0x50] sm:$0xff]  ;;  %v996_v10 = vld [vmem:[%s1123_s2 + $0x68] sm:$0xf]  ;;  %v1001_v11 = vld [vmem:[%s1123_s2 + $0x60] sm:$0xff]  ;;  %vm370_vm6 = vcmask 48128   ;;  %s782_s25 = sshll.u32 %s1124_s3, 4  ;;  %s783_s25 = int_to_ptr.hbm [resolvable:$true] %s782_s25 }
   0x8   :  { %v1008_v12 = vld [vmem:[%s1123_s2 + $0x78] sm:$0xf]  ;;  %v88_v38 = vld [vmem:[%s1123_s2 + $0x30] sm:$0xff]  ;;  %v1028_v43 = vld [vmem:[%s1123_s2 + $0x48] sm:$0xff] }
   0x9   :  { %v89_v34 = vld [vmem:[%s1123_s2 + $0x38] sm:$0xff]  ;;  %v1036_v44 = vld [vmem:[%s1123_s2 + $0x70] sm:$0x3f] }
   0xa   :  { %26 = vperm.xlu0 %830, %v17_v4   ;;  %113 = vperm.xlu2 %832, %v89_v34   ;;  %v85_v42 = vld [vmem:[%s1123_s2 + $0x18] sm:$0xff] }
   0xb   :  { %118 = vperm.xlu1 %831, %v964_v5   ;;  %792 = vmatmul.msk.f32.gmra.mxu0 %vm34_vm0, %v17_v4 }
  0x12   :  { %103 = vperm.xlu0 %830, %v971_v6   ;;  %108 = vperm.xlu2 %832, %v88_v38  }
  0x13   :  { %98 = vperm.xlu1 %831, %v976_v7   ;;  %793 = vmatmul.msk.f32.gmra.mxu0 %vm34_vm0, %v18_v1 }
  0x1a   :  { %220 = vperm.xlu0 %830, %v984_v8   ;;  %93 = vperm.xlu2 %832, %v85_v42  }
  0x1b   :  { %215 = vperm.xlu1 %831, %v989_v9  }
  0x22   :  { %283 = vperm.xlu0 %830, %v996_v10   ;;  %210 = vperm.xlu2 %832, %v1028_v43  }
  0x23   :  { %278 = vperm.xlu1 %831, %v1001_v11  }
  0x2a   :  { %367 = vperm.xlu0 %830, %v1008_v12   ;;  %328 = vperm.xlu2 %832, %v1036_v44  }
  0x64   :  { %v114_v45 = vpop.permute.xlu2 %113 }
  0x6c   :  { %v109_v50 = vpop.permute.xlu2 %108 }
  0x74   :  { %v32_v13 = vpop.permute.xlu0 %31  ;;  %v94_v59 = vpop.permute.xlu2 %93 }
  0x75   :  { %v22_v15 = vpop.permute.xlu1 %21 }
  0x7c   :  { %v27_v16 = vpop.permute.xlu0 %26 }
  0x7d   :  { %v119_v47 = vpop.permute.xlu1 %118 }
  0x80   :  { %v58_v14 = vpop.f32.mrf.mxu0 }
  0x81   :  { %v59_v18 = vadd.f32 %v58_v14, %v22_v15 }
  0x83   :  { %v67_v21 = vsub.f32 0.0, %v59_v18 }
  0x84   :  { %v104_v54 = vpop.permute.xlu0 %103 }
  0x85   :  { %v70_v24 = vmul.f32 1.442695, %v67_v21  ;;  %v99_v56 = vpop.permute.xlu1 %98 }
  0x88   :  { %v61_v17 = vpop.f32.mrf.mxu0 }
  0x89   :  { %v62_v19 = vadd.f32 %v61_v17, %v27_v16 }
  0x8b   :  { %v68_v20 = vsub.f32 0.0, %v62_v19 }
  0x8d   :  { %v72_v22 = vmul.f32 1.442695, %v68_v20 }
  0x8f   :  { %833 = vpow2.f32 %v72_v22 }
  0x90   :  { %v64_v23 = vpop.f32.mrf.mxu0  ;;  %835 = vpow2.f32 %v70_v24 }
  0x91   :  { %v65_v25 = vadd.f32 %v64_v23, %v32_v13 }
  0x93   :  { %v69_v26 = vsub.f32 0.0, %v65_v25 }
  0x95   :  { %v74_v27 = vmul.f32 1.442695, %v69_v26  ;;  %v834_v28 = vpop.eup %833 }
  0x96   :  { %v836_v29 = vpop.eup %835  ;;  %v77_v30 = vadd.f32 1.0, %v834_v28 }
  0x97   :  { %837 = vpow2.f32 %v74_v27  ;;  %v76_v32 = vadd.f32 1.0, %v836_v29 }
  0x98   :  { %839 = vrcp.f32 %v77_v30 }
  0x9d   :  { %v838_v31 = vpop.eup %837 }
  0x9e   :  { %v78_v33 = vadd.f32 1.0, %v838_v31  ;;  %v840_v35 = vpop.eup %839 }
  0x9f   :  { %v83_v40 = vmul.f32 %v840_v35, %v62_v19 }
  0xa0   :  { %841 = vrcp.f32 %v78_v33 }
  0xa1   :  { %843 = vrcp.f32 %v76_v32 }
  0xa6   :  { %v842_v36 = vpop.eup %841 }
  0xa7   :  { %v84_v37 = vmul.f32 %v842_v36, %v65_v25  ;;  %v844_v39 = vpop.eup %843 }
  0xa8   :  { %v82_v41 = vmul.f32 %v844_v39, %v59_v18 }
  0xa9   :  { %147 = vmatpush.msrb.mxu0 %v84_v37  ;;  %815 = vmatpush.msra.mxu1 %v84_v37 }
  0xaa   :  { %816 = vmatpush.msra.mxu3 %v84_v37 }
  0xab   :  { %148 = vmatpush.msrb.mxu0 %v83_v40  ;;  %817 = vmatpush.msra.mxu1 %v83_v40 }
  0xac   :  { %818 = vmatpush.msra.mxu3 %v83_v40 }
  0xad   :  { %149 = vmatpush.msrb.mxu0 %v82_v41  ;;  %819 = vmatpush.msra.mxu1 %v82_v41 }
  0xae   :  { %820 = vmatpush.msra.mxu3 %v82_v41  ;;  %794 = vmatmul.msk.f32.vlgmr.msrb.gmra.mxu0 %vm121_vm1, %v85_v42  ;;  %v216_v41 = vpop.permute.xlu1 %215  ;;  %v211_v42 = vpop.permute.xlu2 %210 }
  0xaf   :  { %795 = vmatmul.msk.f32.vlgmr.msra.gmra.mxu1 %vm121_vm1, %v976_v7  ;;  %799 = vmatmul.msk.f32.vlgmr.msra.gmra.mxu3 %vm121_vm1, %v964_v5 }
  0xb7   :  { %796 = vmatmul.msk.f32.gmra.mxu1 %vm121_vm1, %v971_v6 }
  0xbf   :  { %797 = vmatmul.msk.f32.gmra.mxu1 %vm121_vm1, %v88_v38 }
  0xc7   :  { %798 = vmatmul.msk.f32.gmra.mxu1 %vm121_vm1, %v89_v34 }
 0x12b   :  { %v151_v60 = vpop.f32.mrf.mxu0 }
 0x12c   :  { %v154_v46 = vpop.f32.mrf.mxu1  ;;  %v152_v1 = vadd.f32 %v151_v60, %v94_v59 }
 0x12d   :  { %v155_v61 = vadd.f32 %v154_v46, %v99_v56 }
 0x12e   :  { %v169_v6 = vsub.f32 0.0, %v152_v1 }
 0x12f   :  { %v170_v3 = vsub.f32 0.0, %v155_v61 }
 0x130   :  { %v175_v17 = vmul.f32 1.442695, %v169_v6 }
 0x131   :  { %v177_v14 = vmul.f32 1.442695, %v170_v3 }
 0x132   :  { %v166_v48 = vpop.f32.mrf.mxu3 }
 0x133   :  { %v167_v49 = vadd.f32 %v166_v48, %v119_v47 }
 0x134   :  { %v157_v51 = vpop.f32.mrf.mxu1 }
 0x135   :  { %v174_v52 = vsub.f32 0.0, %v167_v49  ;;  %v158_v57 = vadd.f32 %v157_v51, %v104_v54  ;;  %v221_v51 = vpop.permute.xlu0 %220 }
 0x137   :  { %v185_v53 = vmul.f32 1.442695, %v174_v52  ;;  %v171_v2 = vsub.f32 0.0, %v158_v57 }
 0x139   :  { %845 = vpow2.f32 %v185_v53  ;;  %v179_v7 = vmul.f32 1.442695, %v171_v2  ;;  %v279_v2 = vpop.permute.xlu1 %278 }
 0x13c   :  { %v160_v55 = vpop.f32.mrf.mxu1 }
 0x13d   :  { %v161_v58 = vadd.f32 %v160_v55, %v109_v50 }
 0x13f   :  { %v846_v62 = vpop.eup %845  ;;  %v172_v63 = vsub.f32 0.0, %v161_v58 }
 0x140   :  { %v192_v0 = vadd.f32 1.0, %v846_v62 }
 0x141   :  { %v181_v4 = vmul.f32 1.442695, %v172_v63 }
 0x142   :  { %847 = vrcp.f32 %v192_v0 }
 0x143   :  { %849 = vpow2.f32 %v181_v4 }
 0x144   :  { %v163_v5 = vpop.f32.mrf.mxu1  ;;  %851 = vpow2.f32 %v179_v7  ;;  %v284_v7 = vpop.permute.xlu0 %283 }
 0x145   :  { %v164_v13 = vadd.f32 %v163_v5, %v114_v45  ;;  %853 = vpow2.f32 %v177_v14 }
 0x147   :  { %v173_v15 = vsub.f32 0.0, %v164_v13 }
 0x148   :  { %v848_v16 = vpop.eup %847 }
 0x149   :  { %v183_v18 = vmul.f32 1.442695, %v173_v15  ;;  %v204_v19 = vmul.f32 %v848_v16, %v167_v49  ;;  %v850_v20 = vpop.eup %849 }
 0x14a   :  { %v852_v21 = vpop.eup %851  ;;  %v190_v22 = vadd.f32 1.0, %v850_v20 }
 0x14b   :  { %855 = vpow2.f32 %v183_v18  ;;  %240 = vmatpush.msra.mxu2 %v204_v19  ;;  %v854_v23 = vpop.eup %853  ;;  %v189_v25 = vadd.f32 1.0, %v852_v21 }
 0x14c   :  { %857 = vpow2.f32 %v175_v17  ;;  %v188_v28 = vadd.f32 1.0, %v854_v23  ;;  %v329_v23 = vpop.permute.xlu2 %328 }
 0x14d   :  { %859 = vrcp.f32 %v190_v22 }
 0x151   :  { %v856_v24 = vpop.eup %855 }
 0x152   :  { %v191_v26 = vadd.f32 1.0, %v856_v24  ;;  %v858_v27 = vpop.eup %857 }
 0x153   :  { %v187_v29 = vadd.f32 1.0, %v858_v27  ;;  %v860_v30 = vpop.eup %859 }
 0x154   :  { %861 = vrcp.f32 %v191_v26  ;;  %v202_v34 = vmul.f32 %v860_v30, %v161_v58 }
 0x155   :  { %863 = vrcp.f32 %v189_v25 }
 0x156   :  { %865 = vrcp.f32 %v188_v28 }
 0x157   :  { %867 = vrcp.f32 %v187_v29 }
 0x15a   :  { %v862_v31 = vpop.eup %861 }
 0x15b   :  { %v203_v32 = vmul.f32 %v862_v31, %v164_v13  ;;  %v864_v33 = vpop.eup %863 }
 0x15c   :  { %v866_v35 = vpop.eup %865  ;;  %v201_v36 = vmul.f32 %v864_v33, %v158_v57 }
 0x15d   :  { %241 = vmatpush.msra.mxu2 %v203_v32  ;;  %v868_v37 = vpop.eup %867  ;;  %v200_v38 = vmul.f32 %v866_v35, %v155_v61  ;;  %v368_v32 = vpop.permute.xlu0 %367 }
 0x15e   :  { %v199_v39 = vmul.f32 %v868_v37, %v152_v1 }
 0x15f   :  { %242 = vmatpush.msra.mxu2 %v202_v34 }
 0x161   :  { %243 = vmatpush.msra.mxu2 %v201_v36 }
 0x163   :  { %244 = vmatpush.msra.mxu2 %v200_v38 }
 0x165   :  { %245 = vmatpush.msra.mxu2 %v199_v39 }
 0x166   :  { %800 = vmatmul.msk.f32.vlgmr.msra.gmra.mxu2 %vm223_vm2, %v1028_v43 }
 0x16e   :  { %801 = vmatmul.msk.f32.gmra.mxu2 %vm223_vm2, %v989_v9 }
 0x176   :  { %802 = vmatmul.msk.f32.gmra.mxu2 %vm223_vm2, %v984_v8 }
 0x1e9   :  { %v247_v40 = vpop.f32.mrf.mxu2 }
 0x1ea   :  { %v248_v46 = vadd.f32 %v247_v40, %v211_v42 }
 0x1ec   :  { %v256_v49 = vsub.f32 0.0, %v248_v46 }
 0x1ee   :  { %v259_v53 = vmul.f32 1.442695, %v256_v49 }
 0x1f1   :  { %v250_v45 = vpop.f32.mrf.mxu2 }
 0x1f2   :  { %v251_v47 = vadd.f32 %v250_v45, %v216_v41 }
 0x1f4   :  { %v257_v48 = vsub.f32 0.0, %v251_v47 }
 0x1f6   :  { %v261_v50 = vmul.f32 1.442695, %v257_v48  ;;  %v921_v48 = vmov 2475754826  }
 0x1f8   :  { %869 = vpow2.f32 %v261_v50 }
 0x1f9   :  { %v253_v52 = vpop.f32.mrf.mxu2  ;;  %871 = vpow2.f32 %v259_v53 }
 0x1fa   :  { %v254_v54 = vadd.f32 %v253_v52, %v221_v51  ;;  %v922_v51 = vmov 2131351028  }
 0x1fc   :  { %v258_v55 = vsub.f32 0.0, %v254_v54 }
 0x1fe   :  { %v263_v43 = vmul.f32 1.442695, %v258_v55  ;;  %v870_v9 = vpop.eup %869 }
 0x1ff   :  { %v872_v8 = vpop.eup %871  ;;  %v266_v56 = vadd.f32 1.0, %v870_v9  ;;  %v924_v9 = vmov 920167782  }
 0x200   :  { %873 = vpow2.f32 %v263_v43  ;;  %v265_v58 = vadd.f32 1.0, %v872_v8 }
 0x201   :  { %875 = vrcp.f32 %v266_v56 }
 0x206   :  { %v874_v57 = vpop.eup %873 }
 0x207   :  { %v267_v59 = vadd.f32 1.0, %v874_v57  ;;  %v876_v60 = vpop.eup %875  ;;  %v925_v57 = vmov 1326507024  }
 0x208   :  { %v272_v0 = vmul.f32 %v876_v60, %v251_v47 }
 0x209   :  { %877 = vrcp.f32 %v267_v59 }
 0x20a   :  { %879 = vrcp.f32 %v265_v58 }
 0x20f   :  { %v878_v61 = vpop.eup %877 }
 0x210   :  { %v273_v62 = vmul.f32 %v878_v61, %v254_v54  ;;  %v880_v63 = vpop.eup %879  ;;  %v923_v54 = vmov 2102212464  }
 0x211   :  { %v271_v1 = vmul.f32 %v880_v63, %v248_v46  ;;  %v920_v46 = vmov 683565275  }
 0x212   :  { %303 = vmatpush.msrb.mxu3 %v273_v62 }
 0x214   :  { %304 = vmatpush.msrb.mxu3 %v272_v0 }
 0x216   :  { %305 = vmatpush.msrb.mxu3 %v271_v1 }
 0x217   :  { %803 = vmatmul.msk.f32.vlgmr.msrb.gmra.mxu3 %vm121_vm1, %v1001_v11 }
 0x21f   :  { %804 = vmatmul.msk.f32.gmra.mxu3 %vm121_vm1, %v996_v10 }
 0x29a   :  { %v307_v3 = vpop.f32.mrf.mxu3 }
 0x29b   :  { %v308_v4 = vadd.f32 %v307_v3, %v279_v2 }
 0x29d   :  { %v313_v5 = vsub.f32 0.0, %v308_v4 }
 0x29f   :  { %v315_v6 = vmul.f32 1.442695, %v313_v5 }
 0x2a1   :  { %881 = vpow2.f32 %v315_v6 }
 0x2a2   :  { %v310_v13 = vpop.f32.mrf.mxu3 }
 0x2a3   :  { %v311_v14 = vadd.f32 %v310_v13, %v284_v7 }
 0x2a5   :  { %v314_v15 = vsub.f32 0.0, %v311_v14 }
 0x2a7   :  { %v317_v16 = vmul.f32 1.442695, %v314_v15  ;;  %v882_v17 = vpop.eup %881 }
 0x2a8   :  { %v319_v18 = vadd.f32 1.0, %v882_v17 }
 0x2a9   :  { %883 = vpow2.f32 %v317_v16 }
 0x2aa   :  { %885 = vrcp.f32 %v319_v18 }
 0x2af   :  { %v884_v19 = vpop.eup %883 }
 0x2b0   :  { %v320_v20 = vadd.f32 1.0, %v884_v19  ;;  %v886_v11 = vpop.eup %885 }
 0x2b1   :  { %v323_v22 = vmul.f32 %v886_v11, %v308_v4 }
 0x2b2   :  { %887 = vrcp.f32 %v320_v20 }
 0x2b8   :  { %v888_v10 = vpop.eup %887 }
 0x2b9   :  { %v324_v21 = vmul.f32 %v888_v10, %v311_v14 }
 0x2bb   :  { %805 = vmatpush.msk.msra.mxu3 %vm334_vm3, %v324_v21 }
 0x2bd   :  { %353 = vmatpush.msra.mxu3 %v323_v22 }
 0x2be   :  { %806 = vmatmul.msk.f32.vlgmr.msra.gmra.mxu3 %vm331_vm4, %v1036_v44 }
 0x341   :  { %v355_v24 = vpop.f32.mrf.mxu3 }
 0x342   :  { %v356_v25 = vadd.f32 %v355_v24, %v329_v23 }
 0x344   :  { %v358_v26 = vsub.f32 0.0, %v356_v25 }
 0x346   :  { %v359_v27 = vmul.f32 1.442695, %v358_v26 }
 0x348   :  { %889 = vpow2.f32 %v359_v27 }
 0x34e   :  { %v890_v28 = vpop.eup %889 }
 0x34f   :  { %v361_v29 = vadd.f32 1.0, %v890_v28 }
 0x351   :  { %891 = vrcp.f32 %v361_v29 }
 0x357   :  { %v892_v30 = vpop.eup %891 }
 0x358   :  { %v363_v31 = vmul.f32 %v892_v30, %v356_v25  ;;  %v926_v30 = vmov 0  }
 0x35a   :  { %807 = vmatpush.msk.msra.mxu0 %vm373_vm5, %v363_v31 }
 0x35b   :  { %808 = vmatmul.msk.f32.vlgmr.msra.gmra.mxu0 %vm370_vm6, %v1008_v12 }
 0x3d8   :  { %v394_v33 = vpop.f32.mrf.mxu0 }
 0x3d9   :  { %v1050_v34 = vadd.f32 %v394_v33, %v368_v32 }
 0x3db   :  { %v400_v44 = vand.u32 2139095040, %v1050_v34  ;;  %v397_v37 = vand.u32 2147483647, %v1050_v34  ;;  %vm399_vm3 = vcmp.lt.s32.totalorder %v1050_v34, 0 }
 0x3dd   :  { %v401_v35 = vshrl.u32 %v400_v44, 23  ;;  %v404_v39 = vand.u32 8388607, %v397_v37  ;;  %vm398_vm4 = vcmp.le.f32.partialorder %v397_v37, 0.7853982 }
 0x3df   :  { %v809_v36 = vadd.s32 4294967169, %v401_v35  ;;  %v405_v12 = vor.u32 8388608, %v404_v39 }
 0x3e1   :  { %v407_v38 = vadd.s32 1, %v809_v36  ;;  %v1067_v0 = vshll.u32 %v405_v12, 8 }
 0x3e3   :  { %vm408_vm7 = vcmp.gt.s32.totalorder %v407_v38, 0  ;;  %v446_v14 = vand.u32 65535, %v1067_v0  ;;  %v447_v15 = vshrl.u32 %v1067_v0, 16 }
 0x3e4   :  { %v409_v40 = vsel %vm408_vm7, %v407_v38, 0 }
 0x3e5   :  { %v411_v41 = vand.u32 31, %v409_v40  ;;  %v1058_v45 = vshrl.u32 %v409_v40, 5 }
 0x3e7   :  { %v1056_v42 = vsub.s32 32, %v411_v41  ;;  %v414_v47 = vshll.u32 %v920_v46, %v411_v41  ;;  %v417_v49 = vshll.u32 %v921_v48, %v411_v41  ;;  %v420_v53 = vshll.u32 %v922_v51, %v411_v41 }
 0x3e8   :  { %v423_v43 = vshll.u32 %v923_v54, %v411_v41  ;;  %v426_v56 = vshll.u32 %v924_v9, %v411_v41  ;;  %vm429_vm8 = vcmp.lt.s32.totalorder %v1058_v45, 1  ;;  %vm432_vm9 = vcmp.lt.s32.totalorder %v1058_v45, 4 }
 0x3e9   :  { %v415_v50 = vshrl.u32 %v921_v48, %v1056_v42  ;;  %v418_v52 = vshrl.u32 %v922_v51, %v1056_v42  ;;  %v421_v55 = vshrl.u32 %v923_v54, %v1056_v42  ;;  %v424_v8 = vshrl.u32 %v924_v9, %v1056_v42 }
 0x3ea   :  { %v427_v58 = vshrl.u32 %v925_v57, %v1056_v42  ;;  %vm431_vm10 = vcmp.lt.s32.totalorder %v1058_v45, 3  ;;  %vm430_vm11 = vcmp.lt.s32.totalorder %v1058_v45, 2  ;;  %v413_v40 = vshrl.u32 %v920_v46, %v1056_v42 }
 0x3eb   :  { %v416_v59 = vor.u32 %v415_v50, %v414_v47  ;;  %v419_v60 = vor.u32 %v418_v52, %v417_v49  ;;  %v422_v61 = vor.u32 %v421_v55, %v420_v53  ;;  %v425_v62 = vor.u32 %v424_v8, %v423_v43 }
 0x3ec   :  { %v428_v63 = vor.u32 %v427_v58, %v426_v56 }
 0x3ed   :  { %v437_v1 = vsel %vm429_vm8, %v416_v59, %v419_v60  ;;  %v441_v2 = vsel %vm429_vm8, %v419_v60, %v422_v61  ;;  %v438_v3 = vsel %vm432_vm9, %v425_v62, 920167782  ;;  %v434_v36 = vsel %vm432_vm9, %v422_v61, 2102212464 }
 0x3ee   :  { %v442_v4 = vsel %vm432_vm9, %v428_v63, 1326507024  ;;  %v439_v5 = vsel %vm431_vm10, %v422_v61, %v438_v3  ;;  %v433_v50 = vsel %vm429_vm8, %v413_v40, %v416_v59  ;;  %v435_v51 = vsel %vm431_vm10, %v419_v60, %v434_v36 }
 0x3ef   :  { %v443_v6 = vsel %vm431_vm10, %v425_v62, %v442_v4  ;;  %v440_v7 = vsel %vm430_vm11, %v437_v1, %v439_v5  ;;  %v436_v42 = vsel %vm430_vm11, %v433_v50, %v435_v51 }
 0x3f0   :  { %v444_v13 = vsel %vm430_vm11, %v441_v2, %v443_v6  ;;  %v470_v18 = vand.u32 65535, %v440_v7  ;;  %v471_v19 = vshrl.u32 %v440_v7, 16  ;;  %v490_v56 = vmul.u32 %v1067_v0, %v436_v42 }
 0x3f1   :  { %v448_v16 = vand.u32 65535, %v444_v13  ;;  %v449_v17 = vshrl.u32 %v444_v13, 16  ;;  %vm540_vm11 = vweird.f32 %v1050_v34 }
 0x3f2   :  { %v473_v10 = vmul.u32 %v471_v19, %v446_v14  ;;  %v474_v21 = vmul.u32 %v470_v18, %v447_v15  ;;  %v472_v25 = vmul.u32 %v470_v18, %v446_v14  ;;  %v475_v29 = vmul.u32 %v471_v19, %v447_v15 }
 0x3f3   :  { %v451_v20 = vmul.u32 %v449_v17, %v446_v14  ;;  %v452_v11 = vmul.u32 %v448_v16, %v447_v15  ;;  %v450_v22 = vmul.u32 %v448_v16, %v446_v14  ;;  %v453_v24 = vmul.u32 %v449_v17, %v447_v15 }
 0x3f4   :  { %v476_v26 = vshll.u32 %v473_v10, 16  ;;  %v478_v32 = vshll.u32 %v474_v21, 16  ;;  %v477_v48 = vshrl.u32 %v473_v10, 16  ;;  %v479_v54 = vshrl.u32 %v474_v21, 16 }
 0x3f5   :  { %v454_v23 = vshll.u32 %v451_v20, 16  ;;  %v456_v27 = vshll.u32 %v452_v11, 16  ;;  %v455_v41 = vshrl.u32 %v451_v20, 16  ;;  %v457_v52 = vshrl.u32 %v452_v11, 16 }
 0x3f6   :  { %vm480_vm13 = vc.u32 %v472_v25, %v476_v26  ;;  %v482_v33 = vadd.s32 %v476_v26, %v472_v25 }
 0x3f7   :  { %vm458_vm12 = vc.u32 %v450_v22, %v454_v23  ;;  %v460_v28 = vadd.s32 %v454_v23, %v450_v22  ;;  %v481_v35 = vsel %vm480_vm13, 1, %v926_v30 }
 0x3f8   :  { %v459_v31 = vsel %vm458_vm12, 1, %v926_v30  ;;  %v483_v39 = vadd.s32 %v481_v35, %v475_v29  ;;  %vm484_vm15 = vc.u32 %v482_v33, %v478_v32  ;;  %v486_v9 = vadd.s32 %v482_v33, %v478_v32 }
 0x3f9   :  { %v461_v44 = vadd.s32 %v459_v31, %v453_v24  ;;  %vm462_vm14 = vc.u32 %v460_v28, %v456_v27  ;;  %v485_v47 = vsel %vm484_vm15, 1, %v926_v30 }
 0x3fa   :  { %v463_v38 = vsel %vm462_vm14, 1, %v926_v30  ;;  %v487_v49 = vadd.s32 %v485_v47, %v483_v39 }
 0x3fb   :  { %v465_v12 = vadd.s32 %v463_v38, %v461_v44 }
 0x3fc   :  { %v488_v55 = vadd.s32 %v487_v49, %v477_v48 }
 0x3fd   :  { %v466_v53 = vadd.s32 %v465_v12, %v455_v41 }
 0x3fe   :  { %v489_v46 = vadd.s32 %v488_v55, %v479_v54  ;;  %v734_v54 = vld [vmem:[%s1122_s1 + $0x1] sm:$0x1] }
 0x3ff   :  { %v467_v43 = vadd.s32 %v466_v53, %v457_v52  ;;  %v733_v53 = vld [vmem:[%s1122_s1] sm:$0x1] }
 0x400   :  { %v493_v8 = vadd.s32 1, %v489_v46 }
 0x401   :  { %vm492_vm0 = vc.u32 %v467_v43, %v486_v9  ;;  %v491_v45 = vadd.s32 %v486_v9, %v467_v43  ;;  %v735_v9 = vld [vmem:[%s1122_s1 + $0x2] sm:$0x1]  ;;  %s927_s1 = smov [#allocation2]  }
 0x402   :  { %v494_v57 = vsel %vm492_vm0, %v493_v8, %v489_v46  ;;  %s780_s22 = sshll.u32 %s927_s1, 4  ;;  %s781_s22 = int_to_ptr.vmem [resolvable:$true] %s780_s22 }
 0x403   :  { %v495_v58 = vadd.s32 %v494_v57, %v490_v56 }
 0x405   :  { %v496_v59 = vadd.s32 536870912, %v495_v58 }
 0x407   :  { %v497_v61 = vshrl.u32 %v496_v59, 30  ;;  %v761_v59 = vrot.slane %v734_v54, 7 }
 0x409   :  { %v498_v62 = vshll.u32 %v497_v61, 30  ;;  %v521_v21 = vsub.s32 4, %v497_v61 }
 0x40b   :  { %v499_v60 = vsub.s32 %v495_v58, %v498_v62  ;;  %v522_v25 = vsel %vm399_vm3, %v521_v21, %v497_v61  ;;  %v757_v58 = vrot.slane %v733_v53, 7 }
 0x40c   :  { %v524_v28 = vsel %vm398_vm4, 0, %v522_v25 }
 0x40d   :  { %vm500_vm1 = vcmp.lt.s32.totalorder %v499_v60, 0  ;;  %v501_v63 = vsub.s32 0, %v499_v60  ;;  %v695_v33 = vadd.s32 3, %v524_v28  ;;  %v541_v38 = vand.u32 3, %v524_v28 }
 0x40f   :  { %v502_v1 = vsel %vm500_vm1, %v501_v63, %v499_v60  ;;  %v696_v39 = vand.u32 3, %v695_v33  ;;  %vm542_vm5 = vcmp.lt.s32.totalorder %v541_v38, 2  ;;  %vm543_vm6 = vcmp.eq.s32.totalorder %v541_v38, 0 }
 0x410   :  { %v503_v2 = vclz %v502_v1  ;;  %vm546_vm7 = vcmp.eq.s32.totalorder %v541_v38, 2 }
 0x411   :  { %vm697_vm8 = vcmp.lt.s32.totalorder %v696_v39, 2  ;;  %vm698_vm9 = vcmp.eq.s32.totalorder %v696_v39, 0  ;;  %vm701_vm10 = vcmp.eq.s32.totalorder %v696_v39, 2 }
 0x412   :  { %v810_v3 = vadd.s32 4294967294, %v503_v2 }
 0x414   :  { %vm811_vm2 = vcmp.lt.s32.totalorder %v810_v3, 0 }
 0x415   :  { %v506_v4 = vsel %vm811_vm2, 0, %v810_v3 }
 0x416   :  { %v507_v5 = vsub.s32 32, %v506_v4  ;;  %v511_v6 = vsub.s32 4294967266, %v506_v4  ;;  %v508_v7 = vshll.u32 %v499_v60, %v506_v4  ;;  %v766_v60 = vrot.slane %v735_v9, 7 }
 0x418   :  { %v509_v13 = vshrl.u32 %v491_v45, %v507_v5  ;;  %v512_v14 = vadd.s32 127, %v511_v6 }
 0x41a   :  { %v510_v0 = vor.u32 %v509_v13, %v508_v7  ;;  %v513_v15 = vshll.u32 %v512_v14, 23 }
 0x41c   :  { %v514_v16 = vor.u32 4788187, %v513_v15  ;;  %v517_v18 = vcvt.s32.f32 %v510_v0 }
 0x41e   :  { %v515_v17 = vand.u32 2147483647, %v514_v16 }
 0x420   :  { %v518_v19 = vmul.f32 %v517_v18, %v515_v17 }
 0x422   :  { %v519_v20 = vxor.u32 2147483648, %v518_v19 }
 0x424   :  { %v520_v11 = vsel %vm399_vm3, %v519_v20, %v518_v19 }
 0x425   :  { %v523_v10 = vsel %vm398_vm4, %v1050_v34, %v520_v11 }
 0x426   :  { %v525_v22 = vmul.f32 %v523_v10, %v523_v10 }
 0x428   :  { %v526_v23 = vmul.f32 -0.001358992, %v525_v22  ;;  %v533_v24 = vmul.f32 -0.00019511016, %v525_v22 }
 0x42a   :  { %v527_v26 = vadd.f32 0.041655596, %v526_v23  ;;  %v534_v27 = vadd.f32 0.008332121, %v533_v24 }
 0x42c   :  { %v528_v29 = vmul.f32 %v527_v26, %v525_v22  ;;  %v535_v30 = vmul.f32 %v534_v27, %v525_v22 }
 0x42e   :  { %v529_v31 = vadd.f32 -0.4999988, %v528_v29  ;;  %v536_v32 = vadd.f32 -0.16666654, %v535_v30 }
 0x430   :  { %v530_v44 = vmul.f32 %v529_v31, %v525_v22  ;;  %v537_v35 = vmul.f32 %v536_v32, %v525_v22 }
 0x432   :  { %v531_v36 = vadd.f32 1.0, %v530_v44  ;;  %v538_v37 = vadd.f32 1.0, %v537_v35 }
 0x434   :  { %v539_v40 = vmul.f32 %v538_v37, %v523_v10  ;;  %v547_v41 = vxor.u32 2147483648, %v531_v36 }
 0x436   :  { %v544_v12 = vxor.u32 2147483648, %v539_v40  ;;  %v548_v48 = vsel %vm546_vm7, %v547_v41, %v539_v40  ;;  %v703_v50 = vsel %vm701_vm10, %v547_v41, %v539_v40 }
 0x438   :  { %v545_v47 = vsel %vm543_vm6, %v531_v36, %v544_v12  ;;  %v700_v49 = vsel %vm698_vm9, %v531_v36, %v544_v12 }
 0x439   :  { %v549_v51 = vsel %vm542_vm5, %v545_v47, %v548_v48  ;;  %v704_v52 = vsel %vm697_vm8, %v700_v49, %v703_v50 }
 0x43a   :  { %v550_v55 = vsel %vm540_vm11, nan, %v549_v51  ;;  %v705_v43 = vsel %vm540_vm11, nan, %v704_v52 }
 0x43b   :  { %v707_v42 = vrot.slane %v550_v55, 1  ;;  %v711_v46 = vrot.slane %v705_v43, 1  ;;  %v714_v8 = vrot.slane %v705_v43, 2  ;;  %v717_v56 = vrot.slane %v550_v55, 2 }
 0x43c   :  { %v732_v57 = vsub.f32 0.0, %v705_v43 }
 0x43d   :  { %v709_v61 = vmul.f32 %v707_v42, %v550_v55  ;;  %v713_v62 = vmul.f32 %v711_v46, %v550_v55  ;;  %v719_v63 = vmul.f32 %v717_v56, %v705_v43  ;;  %v722_v1 = vmul.f32 %v714_v8, %v705_v43 }
 0x43e   :  { %v724_v2 = vmul.f32 %v707_v42, %v705_v43  ;;  %v725_v3 = vmul.f32 %v711_v46, %v705_v43  ;;  %v727_v5 = vmul.f32 %v717_v56, %v550_v55  ;;  %v730_v6 = vmul.f32 %v714_v8, %v550_v55 }
 0x43f   :  { %v716_v4 = vmul.f32 %v714_v8, %v713_v62  ;;  %v721_v45 = vmul.f32 %v717_v56, %v713_v62  ;;  %v759_v14 = vmul.f32 %v757_v58, %v732_v57  ;;  %v763_v0 = vmul.f32 %v761_v59, %v713_v62 }
 0x440   :  { %v726_v7 = vmul.f32 %v725_v3, %v714_v8  ;;  %v729_v13 = vmul.f32 %v725_v3, %v717_v56  ;;  %v768_v20 = vmul.f32 %v766_v60, %v709_v61  ;;  %v736_v11 = vmul.f32 %v733_v53, %v709_v61 }
 0x441   :  { %v720_v15 = vsub.f32 %v716_v4, %v719_v63  ;;  %v723_v16 = vadd.f32 %v722_v1, %v721_v45  ;;  %v764_v19 = vadd.f32 %v763_v0, %v759_v14  ;;  %v746_v21 = vmul.f32 %v733_v53, %v724_v2 }
 0x442   :  { %v728_v17 = vadd.f32 %v727_v5, %v726_v7  ;;  %v731_v18 = vsub.f32 %v729_v13, %v730_v6 }
 0x443   :  { %v737_v10 = vmul.f32 %v734_v54, %v720_v15  ;;  %v769_v23 = vadd.f32 %v768_v20, %v764_v19  ;;  %v739_v25 = vmul.f32 %v735_v9, %v723_v16 }
 0x444   :  { %v747_v22 = vmul.f32 %v734_v54, %v728_v17  ;;  %v749_v27 = vmul.f32 %v735_v9, %v731_v18 }
 0x445   :  { %v738_v24 = vadd.f32 %v737_v10, %v736_v11  ;;  %v771_v28 = vrot.slane %v769_v23, 6 }
 0x446   :  { %v748_v26 = vadd.f32 %v747_v22, %v746_v21 }
 0x447   :  { %v740_v29 = vadd.f32 %v739_v25, %v738_v24  ;;  %v773_v31 = vmul.f32 %v771_v28, %v1050_v34 }
 0x448   :  { %v750_v30 = vadd.f32 %v749_v27, %v748_v26 }
 0x449   :  { %v742_v32 = vrot.slane %v740_v29, 5  ;;  %774 = vst [vmem:[#allocation2 - $0x1] sm:$0x8] %v773_v31 }
 0x44a   :  { %v752_v33 = vrot.slane %v750_v30, 5 }
 0x44b   :  { %v744_v44 = vmul.f32 %v742_v32, %v1050_v34 }
 0x44c   :  { %v754_v35 = vmul.f32 %v752_v33, %v1050_v34 }
 0x44d   :  { %745 = vst [vmem:[#allocation2 - $0x3] sm:$0x8] %v744_v44 }
 0x44e   :  { %755 = vst [vmem:[#allocation2 - $0x2] sm:$0x8] %v754_v35 }
 0x44f   :  { %785 = dma.vmem_to_hbm [thread:$0]  %s781_s22, 64, %s783_s25, [#allocation3]  }
 0x450   :  { %917 = dma.done.wait [#allocation3], 64  }
 0x451   :  { %918 = vsyncadd [#allocation3], 4294967232 }
 0x452   :  { %790 = vsyncpa [#allocation3], 1 }

</bundles_post_ra>
